<compile_context>
chip_gen: v7x
topology: tpu7x:2x2x1
jax: 0.10.0
libtpu: 0.0.40
codegen_flags: <defaults>
</compile_context>

<pallas_src>
import math

import jax
import jax.numpy as jnp
from jax import lax
from jax.experimental import pallas as pl
from jax.experimental.pallas import tpu as pltpu


def _round_up(x, m):
    return ((x + m - 1) // m) * m


def _cdiv(a, b):
    return (a + b - 1) // b


def _vmem_limit_bytes():
    # Generation-aware scoped-VMEM budget (v5e/v6e: 128 MiB, v7x: 64 MiB),
    # leaving headroom for Mosaic-internal scratch / double buffers.
    try:
        cap = int(pltpu.get_tpu_info().vmem_capacity_bytes)
    except Exception:
        cap = 64 * 1024 * 1024
    return max(32 * 1024 * 1024, cap - 16 * 1024 * 1024)


# ---------------------------------------------------------------------------
# Pallas kernel factory: one (tm, tk) x (tk, tn) MXU step of the grouped GEMM,
# f32 VMEM accumulator, bias add + transpose + cast fused into the last K step.
# ---------------------------------------------------------------------------
def _make_gemm_kernel(kt, tk, k_valid_last):
    mask_last = (k_valid_last != tk) and (kt > 1)

    def kernel(p_ref, w_ref, b_ref, o_ref, *scratch):
        k = pl.program_id(4)
        p = p_ref[0, 0]                                     # (tm, tk) bf16
        if mask_last:
            # Ragged K edge: zero out-of-range patch columns so the zero-padded
            # weight tail contributes exactly 0 to the accumulator.
            lane = lax.broadcasted_iota(jnp.int32, p.shape, 1)
            limit = jnp.where(k == kt - 1, k_valid_last, tk)
            p = jnp.where(lane < limit, p, jnp.zeros_like(p))

        d = jnp.dot(p, w_ref[0], preferred_element_type=jnp.float32)  # (tm, tn)

        if kt == 1:
            # Single K block: no scratch, no accumulator traffic at all.
            r = d + b_ref[0]
            o_ref[0, 0] = jnp.transpose(r).astype(o_ref.dtype)
        else:
            acc_ref = scratch[0]

            @pl.when(k == 0)
            def _():
                acc_ref[...] = d                      # direct assign, no zero-fill

            @pl.when(jnp.logical_and(k > 0, k < kt - 1))
            def _():
                acc_ref[...] += d

            @pl.when(k == kt - 1)
            def _():
                # No acc store on the last step: read, add, bias, transpose, cast.
                r = acc_ref[...] + d + b_ref[0]
                o_ref[0, 0] = jnp.transpose(r).astype(o_ref.dtype)

    return kernel


# ---------------------------------------------------------------------------
# Grouped GEMM + bias:
#   patches_g: (G, N, Mhw, K) bf16, w_mat: (G, K, Op) bf16, bias: (G, 1, Op) f32
#   -> out (N, G, Op, Mhw) out_dtype      (Op multiple of 128, lane-dense)
# ---------------------------------------------------------------------------
def _pallas_grouped_conv_gemm(patches_g, w_mat, bias_mat, out_dtype,
                              *, tm_max=512, k_whole_max=2048, tk_max=1024):
    G, N, Mhw, K = patches_g.shape
    _, _, Op = w_mat.shape

    # O tile: lane-dense and as wide as Op allows -> patches streamed once.
    tn = 128
    for cand in (512, 256):
        if Op % cand == 0:
            tn = cand
            break

    # M tile: big (amortize per-step overhead); ragged edge handled by Pallas.
    tm = min(tm_max, Mhw)

    # K tile: whole-K resident when it fits; else a multiple-of-128 divisor of
    # K (no pad, no mask); else tile at tk_max, zero-pad the *small* weights
    # and mask the ragged patch tail in-kernel (never pad patches in HBM).
    if K <= k_whole_max:
        tk = K
    else:
        tk = 0
        for cand in range(tk_max // 128, 0, -1):
            if K % (cand * 128) == 0:
                tk = cand * 128
                break
        if tk == 0:
            tk = tk_max
    kt = _cdiv(K, tk)
    k_valid_last = K - (kt - 1) * tk
    Kp = kt * tk
    if Kp != K:
        w_mat = jnp.pad(w_mat, ((0, 0), (0, Kp - K), (0, 0)))

    # v7x megacore: keep >= 2 blocks along some parallel axis when possible.
    if N * G * _cdiv(Mhw, tm) * (Op // tn) == 1 and Mhw > 128:
        tm = max(128, _round_up(_cdiv(Mhw, 2), 128))

    grid = (N, G, _cdiv(Mhw, tm), Op // tn, kt)

    kernel = _make_gemm_kernel(kt, tk, k_valid_last)
    scratch = [pltpu.VMEM((tm, tn), jnp.float32)] if kt > 1 else []

    cost = pl.CostEstimate(
        flops=int(2 * G * N * Mhw * Kp * Op),
        transcendentals=0,
        bytes_accessed=int(
            patches_g.size * patches_g.dtype.itemsize * (Op // tn)     # restream
            + w_mat.size * w_mat.dtype.itemsize * _cdiv(Mhw, tm)
            + bias_mat.size * bias_mat.dtype.itemsize
            + G * N * Mhw * Op * jnp.dtype(out_dtype).itemsize))

    return pl.pallas_call(
        kernel,
        out_shape=jax.ShapeDtypeStruct((N, G, Op, Mhw), out_dtype),
        grid=grid,
        in_specs=[
            pl.BlockSpec((1, 1, tm, tk), lambda n, g, i, j, k: (g, n, i, k)),
            pl.BlockSpec((1, tk, tn), lambda n, g, i, j, k: (g, k, j)),
            pl.BlockSpec((1, 1, tn), lambda n, g, i, j, k: (g, 0, j)),
        ],
        out_specs=pl.BlockSpec((1, 1, tn, tm),
                               lambda n, g, i, j, k: (n, g, j, i)),
        scratch_shapes=scratch,
        compiler_params=pltpu.CompilerParams(
            dimension_semantics=("parallel", "parallel", "parallel",
                                 "parallel", "arbitrary"),
            vmem_limit_bytes=_vmem_limit_bytes()),
        cost_estimate=cost,
    )(patches_g, w_mat, bias_mat)


# ---------------------------------------------------------------------------
# Glue: exact reproduction of conv2d_same_padding() from train.py.
# NOTE: the original derives the *column* padding from the ROW formula
# (a quirk of that implementation) — reproduced faithfully here.
# ---------------------------------------------------------------------------
def conv2d_same_padding_pallas(x, weight, bias=None, stride=(1, 1),
                               dilation=(1, 1), groups=1):
    N, C, H, W = x.shape
    O, Cg, kh, kw = weight.shape
    G = groups
    og = O // G
    Kg = Cg * kh * kw

    # --- "same padding" arithmetic: verbatim port of the PyTorch helper ---
    out_rows = (H + stride[0] - 1) // stride[0]
    padding_rows = max(0, (out_rows - 1) * stride[0]
                       + (kh - 1) * dilation[0] + 1 - H)
    rows_odd = padding_rows % 2 != 0
    padding_cols = padding_rows          # quirk: derived from ROW formula
    cols_odd = rows_odd
    pad_spec = ((padding_rows // 2, padding_rows // 2 + int(rows_odd)),
                (padding_cols // 2, padding_cols // 2 + int(cols_odd)))

    # --- im2col as a single XLA op, in bf16 (identity filters => exact). ---
    # TODO(synk): fuse im2col into the Pallas pipeline (pl.ANY input + manual
    # make_async_copy of overlapping row slabs) to avoid materializing the
    # kh*kw-amplified patch matrix in HBM.
    x_bf = x.astype(jnp.bfloat16)
    patches = lax.conv_general_dilated_patches(
        x_bf, filter_shape=(kh, kw), window_strides=tuple(stride),
        padding=pad_spec, rhs_dilation=tuple(dilation),
        dimension_numbers=("NCHW", "OIHW", "NHWC"))      # (N, Ho, Wo, C*kh*kw)
    _, Ho, Wo, _ = patches.shape
    Mhw = Ho * Wo

    # (N, Ho, Wo, G*Kg) -> (G, N, Mhw, Kg); free reshape when groups == 1.
    if G == 1:
        patches_g = patches.reshape(1, N, Mhw, Kg)
    else:
        # TODO(synk): avoid this HBM transpose for grouped convs (block-diag
        # weight packing or strided BlockSpec over the flattened group axis).
        patches_g = jnp.transpose(patches.reshape(N, Mhw, G, Kg), (2, 0, 1, 3))

    # weight (O, Cg, kh, kw) -> (G, Kg, og_pad).  og padded to 128, or to a
    # multiple of 256 when larger, so tn can be 256/512 (v6e/v7x MXU width).
    og_pad = _round_up(og, 128)
    if og_pad > 128 and og_pad % 256 != 0:
        og_pad = _round_up(og, 256)
    w_mat = jnp.transpose(weight.reshape(G, og, Kg), (0, 2, 1))   # (G, Kg, og)
    if og_pad != og:
        w_mat = jnp.pad(w_mat, ((0, 0), (0, 0), (0, og_pad - og)))

    if bias is None:
        bias_mat = jnp.zeros((G, 1, og_pad), dtype=jnp.float32)
    else:
        bias_mat = bias.astype(jnp.float32).reshape(G, 1, og)
        if og_pad != og:
            bias_mat = jnp.pad(bias_mat, ((0, 0), (0, 0), (0, og_pad - og)))

    out_dtype = x.dtype
    y = _pallas_grouped_conv_gemm(patches_g, w_mat.astype(jnp.bfloat16),
                                  bias_mat, out_dtype)    # (N, G, og_pad, Mhw)
    if og_pad != og:
        y = y[:, :, :og, :]
    return y.reshape(N, O, Ho, Wo)                        # NCHW, free reshape


# ---------------------------------------------------------------------------
# Module-equivalent wrapper with deterministic init (uniform(-stdv, stdv)).
# ---------------------------------------------------------------------------
class Conv2dPallas:
    def __init__(self, in_channels, out_channels, kernel_size, stride=1,
                 padding=0, dilation=1, groups=1, bias=True, *, key):
        kernel_size = ((kernel_size, kernel_size)
                       if isinstance(kernel_size, int) else tuple(kernel_size))
        self.stride = (stride, stride) if isinstance(stride, int) else tuple(stride)
        self.dilation = (dilation, dilation) if isinstance(dilation, int) else tuple(dilation)
        self.groups = groups

        n = in_channels
        for k in kernel_size:
            n *= k
        stdv = 1.0 / math.sqrt(n)

        wkey, bkey = jax.random.split(key)
        self.weight = jax.random.uniform(
            wkey, (out_channels, in_channels // groups, *kernel_size),
            minval=-stdv, maxval=stdv, dtype=jnp.float32)
        self.bias = (jax.random.uniform(bkey, (out_channels,),
                                        minval=-stdv, maxval=stdv,
                                        dtype=jnp.float32)
                     if bias else None)

    def __call__(self, x):
        return conv2d_same_padding_pallas(
            x, self.weight, self.bias, self.stride, self.dilation, self.groups)


if __name__ == "__main__":
    key = jax.random.PRNGKey(0)
    kx, kp = jax.random.split(key)

    # small shapes: batch=2, in_channels=4, out_channels=8, spatial=16, k=3
    x = jax.random.normal(kx, (2, 4, 16, 16), dtype=jnp.float32)
    conv = Conv2dPallas(4, 8, 3, key=kp)

    y = jax.block_until_ready(conv(x))

    # Reference: XLA conv on the same bf16-rounded operands (the kernel feeds
    # the MXU bf16 inputs with f32 accumulation), bias added in f32.
    xq = x.astype(jnp.bfloat16).astype(jnp.float32)
    wq = conv.weight.astype(jnp.bfloat16).astype(jnp.float32)
    ref = lax.conv_general_dilated(
        xq, wq, window_strides=conv.stride, padding=((1, 1), (1, 1)),
        rhs_dilation=conv.dilation,
        dimension_numbers=("NCHW", "OIHW", "NCHW"),
        feature_group_count=conv.groups,
        precision=lax.Precision.HIGHEST)
    ref = ref + conv.bias[None, :, None, None]

    assert y.shape == (2, 8, 16, 16), y.shape
    max_err = float(jnp.max(jnp.abs(y - ref)))
    assert jnp.allclose(y, ref, atol=2e-3, rtol=2e-3), max_err

    print("KERNEL_OK")
</pallas_src>

<mosaic_0001>
module attributes {stable_mosaic.version = 11 : i64} {
  func.func @kernel(%arg0: i32, %arg1: i32, %arg2: i32, %arg3: i32, %arg4: i32, %arg5: memref<1x1x256x36xbf16, #tpu.memory_space<vmem>>, %arg6: memref<1x36x128xbf16, #tpu.memory_space<vmem>>, %arg7: memref<1x1x128xf32, #tpu.memory_space<vmem>>, %arg8: memref<1x1x128x256xf32, #tpu.memory_space<vmem>>) attributes {dimension_semantics = [#tpu.dimension_semantics<parallel>, #tpu.dimension_semantics<parallel>, #tpu.dimension_semantics<parallel>, #tpu.dimension_semantics<parallel>, #tpu.dimension_semantics<arbitrary>], iteration_bounds = array<i64: 2, 1, 1, 1, 1>, scalar_prefetch = 0 : i64, scratch_operands = 0 : i64, tpu.core_type = #tpu.core_type<tc>, window_params = [{transform_indices = @transform_0, window_bounds = array<i64: 1, 1, 256, 36>}, {transform_indices = @transform_1, window_bounds = array<i64: 1, 36, 128>}, {transform_indices = @transform_2, window_bounds = array<i64: 1, 1, 128>}, {transform_indices = @transform_3, window_bounds = array<i64: 1, 1, 128, 256>}]} {
    %c0 = arith.constant 0 : index
    %c0_0 = arith.constant 0 : index
    %c0_1 = arith.constant 0 : index
    %c0_2 = arith.constant 0 : index
    %0 = vector.load %arg5[%c0, %c0_0, %c0_1, %c0_2] : memref<1x1x256x36xbf16, #tpu.memory_space<vmem>>, vector<1x1x256x36xbf16>
    %1 = vector.shape_cast %0 : vector<1x1x256x36xbf16> to vector<256x36xbf16>
    %c0_3 = arith.constant 0 : index
    %c0_4 = arith.constant 0 : index
    %c0_5 = arith.constant 0 : index
    %2 = vector.load %arg6[%c0_3, %c0_4, %c0_5] : memref<1x36x128xbf16, #tpu.memory_space<vmem>>, vector<1x36x128xbf16>
    %3 = vector.shape_cast %2 : vector<1x36x128xbf16> to vector<36x128xbf16>
    %cst = arith.constant dense<0.000000e+00> : vector<256x128xf32>
    %4 = tpu.matmul %1, %3, %cst {dimension_numbers = #tpu.dot_dimension_numbers<[1], [0], [0], [1], [0, 0, 1, 1], [], []>} : vector<256x36xbf16>, vector<36x128xbf16>, vector<256x128xf32> -> vector<256x128xf32>
    %c0_6 = arith.constant 0 : index
    %c0_7 = arith.constant 0 : index
    %c0_8 = arith.constant 0 : index
    %5 = vector.load %arg7[%c0_6, %c0_7, %c0_8] : memref<1x1x128xf32, #tpu.memory_space<vmem>>, vector<1x1x128xf32>
    %6 = vector.shape_cast %5 : vector<1x1x128xf32> to vector<1x128xf32>
    %7 = vector.broadcast %6 : vector<1x128xf32> to vector<256x128xf32>
    %8 = arith.addf %4, %7 : vector<256x128xf32>
    %9 = tpu.transpose %8, [1, 0] : vector<256x128xf32> -> vector<128x256xf32>
    %c0_9 = arith.constant 0 : index
    %c0_10 = arith.constant 0 : index
    %c0_11 = arith.constant 0 : index
    %c0_12 = arith.constant 0 : index
    %10 = vector.load %arg8[%c0_9, %c0_10, %c0_11, %c0_12] : memref<1x1x128x256xf32, #tpu.memory_space<vmem>>, vector<1x1x128x256xf32>
    %11 = vector.shape_cast %10 : vector<1x1x128x256xf32> to vector<128x256xf32>
    %12 = vector.shape_cast %9 : vector<128x256xf32> to vector<1x1x128x256xf32>
    tpu.vector_store %arg8[%c0_9, %c0_10, %c0_11, %c0_12], %12 {strides = array<i32>} : memref<1x1x128x256xf32, #tpu.memory_space<vmem>>, vector<1x1x128x256xf32>,
    return
  }
  func.func @transform_0(%arg0: i32, %arg1: i32, %arg2: i32, %arg3: i32, %arg4: i32) -> (i32, i32, i32, i32) {
    %c0_i32 = arith.constant 0 : i32
    return %arg1, %arg0, %arg2, %arg4 : i32, i32, i32, i32
  }
  func.func @transform_1(%arg0: i32, %arg1: i32, %arg2: i32, %arg3: i32, %arg4: i32) -> (i32, i32, i32) {
    %c0_i32 = arith.constant 0 : i32
    return %arg1, %arg4, %arg3 : i32, i32, i32
  }
  func.func @transform_2(%arg0: i32, %arg1: i32, %arg2: i32, %arg3: i32, %arg4: i32) -> (i32, i32, i32) {
    %c0_i32 = arith.constant 0 : i32
    %c0_i32_0 = arith.constant 0 : i32
    return %arg1, %c0_i32, %arg3 : i32, i32, i32
  }
  func.func @transform_3(%arg0: i32, %arg1: i32, %arg2: i32, %arg3: i32, %arg4: i32) -> (i32, i32, i32, i32) {
    %c0_i32 = arith.constant 0 : i32
    return %arg0, %arg1, %arg3, %arg2 : i32, i32, i32, i32
  }
}

</mosaic_0001>

<bundles_post_ra>
// kernel: tpu_custom_call.1
= control target key start
LH: loop header
LB: loop body
LE: loop exit
PB: predicated region body
PF: predicated region fallthrough
CT: control target
= control target key end

     0   :  { %8 = vsyncpa [#allocation3], 0  ;;  %s1465_s0 = inlined_call_operand.vmem [shape: bf16[1,2,256,36], index: 0, kind: input, shape index: {}]   ;;  %s1466_s1 = inlined_call_operand.vmem [shape: bf16[1,36,128], index: 1, kind: input, shape index: {}]   ;;  %s1467_s2 = inlined_call_operand.vmem [shape: f32[1,1,128], index: 2, kind: input, shape index: {}]   ;;  %s1468_s3 = inlined_call_operand.hbm [shape: f32[2,1,128,256], index: 3, kind: output, shape index: {}]  }
   0x1   :  { %10 = vsyncpa [#allocation3 + $0x1], 0  ;;  %s1231_s12 = smov 0   ;;  %s1233_s13 = smov 0  }
   0x2   :  { %s1235_s14 = smov 0   ;;  %s1237_s15 = smov 0  }
   0x3   :  { %s1239_s16 = smov 0   ;;  %s1241_s17 = smov 0  }
   0x4 LB: > { %s934_s18 = sadd.s32 4294967295, %s1206_s17   ;;  %s935_s19 = sadd.s32 4294967294, %s1206_s17   ;;  %s1206_s17 = sphi %s1241_s17, %s16_s17   ;;  %s1202_s16 = sphi %s1239_s16, %s1475_s16   ;;  %s1198_s15 = sphi %s1237_s15, %s1474_s15   ;;  %s1194_s14 = sphi %s1235_s14, %s1473_s14   ;;  %s1190_s13 = sphi %s1233_s13, %s1472_s13   ;;  %s1186_s12 = sphi %s1231_s12, %s1471_s12  }
   0x5   : > { %s49_s20 = sadd.s32 1, %s1202_s16  ;;  %s152_s21 = sadd.s32 1, %s1194_s14 }
   0x6   : > { %p51_p0 = scmp.ge.s32.totalorder %s49_s20, 2  ;;  %p162_p1 = scmp.ne.s32.totalorder %s1194_s14, %s1190_s13 }
   0x7   : > { %p163_p2 = scmp.eq.s32.totalorder %s934_s18, 1  ;;  %p168_p3 = scmp.ne.s32.totalorder %s1190_s13, %s1186_s12 }
   0x8   : > { %s1477_s20 = smov (%p51_p0, %s49_s20), 0  ;;  %p169_p5 = scmp.eq.s32.totalorder %s935_s19, 1 }
   0x9   : > { %p1271_p4 = por %p163_p2, %p162_p1  ;;  %s143_s23 = ssub.s32 %s1202_s16, %s1477_s20 }
   0xa   : > { %p940_p6 = scmp.ge.s32.totalorder %s1206_s17, 1  ;;  %p150_p7 = scmp.eq.s32.totalorder %s143_s23, 0 }
   0xb   : > { %p1278_p8 = por %p169_p5, %p168_p3  ;;  %p232_p9 = scmp.lt.s32.totalorder %s1206_s17, 3 }
   0xc   : > { %s1284_s25 = scalar_select %p150_p7, %s1194_s14, %s152_s21  }
   0xd   : > { %p233_p10 = pnand %p940_p6, %p232_p9 }
   0xe   : > { %v1109_v0 = vld [vmem:[%s1466_s1] sm:$0xff] (!%p233_p10)   ;;  %v1110_v1 = vld [vmem:[%s1466_s1 + $0x8] sm:$0xff] (!%p233_p10)   ;;  %p288_p11 = scmp.lt.s32.totalorder (!%p233_p10), %s1198_s15, 1  ;;  %v1111_v2 = vld [vmem:[%s1466_s1 + $0x10] ss:$0 sps:$4 sm:$0x33] (!%p233_p10)  }
   0xf   : > { %236 = sbr.rel (%p233_p10) target bundleno = 448 (0x1c0), region = 32  ;;  %1006 = vmatprep.subr.bf16.mxu0 (!%p233_p10), %v1109_v0  ;;  %1044 = vmatprep.subr.bf16.mxu1 (!%p233_p10), %v1109_v0  ;;  %vm512_vm0 = vcmask (!%p233_p10), 1041408   ;;  %vm463_vm1 = vcmask (!%p233_p10), 293888   ;;  %v1337_v20 = vld [vmem:[%s1467_s2] ss:$0 sm:$0xff] (!%p233_p10)  ;;  %s282_s18 = sand.u32 (!%p233_p10), 1, %s1190_s13  }
  0x10   : > { %1007 = vmatpush3.bf16.msra.mxu0 (!%p233_p10), %v1109_v0  ;;  %1047 = vmatpush3.bf16.msra.mxu1 (!%p233_p10), %v1109_v0  ;;  %v514_v4 = vsel (!%p233_p10), %vm512_vm0, %v1111_v2, 0  ;;  %s941_s19 = sshll.u32 (!%p233_p10), %s282_s18, 8  ;;  %s986_s23 = sshll.u32 (!%p233_p10), %s1198_s15, 12 }
  0x11   : > { %1008 = vmatprep.subr.bf16.mxu0 (!%p233_p10), %v1110_v1  ;;  %1045 = vmatprep.subr.bf16.mxu1 (!%p233_p10), %v1110_v1  ;;  %s1374_s21 = scalar_lea.vmem (!%p233_p10), [#allocation2], %s941_s19  ;;  %s1411_s29 = scalar_lea.hbm (!%p233_p10), %s1468_s3, %s986_s23 }
  0x12   : > { %s794_s26 = sshll.u32 (!%p233_p10), %s1374_s21, 4  ;;  %s1208_s4 = smov (!%p233_p10), [#allocation2]   ;;  %s1413_s26 = int_to_ptr.vmem [resolvable:$true] %s794_s26 }
  0x13   : > { %s1132_s5 = sshll.u32 (!%p233_p10), %s1208_s4, 4  ;;  %s1133_s5 = int_to_ptr.vmem [resolvable:$false] %s1132_s5 }
  0x14   : > { %1009 = vmatpush3.bf16.msra.mxu0 (!%p233_p10), %v1110_v1  ;;  %1048 = vmatpush3.bf16.msra.mxu1 (!%p233_p10), %v1110_v1  ;;  %p1135_p1 = scmp.lt.s32.totalorder (!%p233_p10), %s1413_s26, %s1133_s5 }
  0x15   : > { %1050 = vmatprep.subr.msk.bf16.mxu0 (!%p233_p10), %vm512_vm0, %v1111_v2  ;;  %1051 = vmatprep.subr.msk.bf16.mxu1 (!%p233_p10), %vm512_vm0, %v1111_v2 }
  0x16   : > { %s289_s30 = scalar_select %p288_p11, %s1198_s15, 1 }
  0x17   : > { %s1419_s15 = scalar_lea.sflag [#allocation3], %s282_s18 }
  0x18   : > { %s985_s6 = sshll.u32 %s289_s30, 7  ;;  %1011 = vmatpush3.bf16.msra.mxu0 %v514_v4  ;;  %1049 = vmatpush3.bf16.msra.mxu1 %v514_v4  ;;  %s1128_s30 = scalar_lea.vmem %s1413_s26, 4096 }
  0x19   : > { %s1300_s9 = scalar_lea.vmem %s1465_s0, %s985_s6  ;;  %p1129_p12 = scmp.ne.s32.totalorder %s1413_s26, %s1128_s30 }
  0x1a   : > { %v1112_v3 = vld [vmem:[%s1300_s9] sm:$0xff]   ;;  %v1114_v6 = vld [vmem:[%s1300_s9 + $0x8] sm:$0xff]   ;;  %v1116_v8 = vld [vmem:[%s1300_s9 + $0x10] sm:$0xff]   ;;  %s1134_s6 = scalar_lea.vmem %s1133_s5, 8192 }
  0x1b   : > { %v1113_v5 = vld [vmem:[%s1300_s9 + $0x40] sm:$0xff]   ;;  %1012 = vmatprep.mubr.msk.bf16.mxu0 %vm463_vm1, %v1112_v3  ;;  %v1115_v7 = vld [vmem:[%s1300_s9 + $0x48] sm:$0xff]   ;;  %v1117_v9 = vld [vmem:[%s1300_s9 + $0x50] sm:$0xff]   ;;  %p1130_p13 = pnand %p1129_p12, %p1271_p4  ;;  %p1136_p2 = scmp.lt.s32.totalorder %s1134_s6, %s1128_s30 }
  0x1c   : > { %1028 = vmatprep.mubr.msk.bf16.mxu1 %vm463_vm1, %v1113_v5  ;;  %1013 = vmatmul.mubr.msk.bf16.vlgmr.msra.gmra.mrb[0].mxu0 %vm463_vm1, %v1114_v6  ;;  %v1118_v10 = vld [vmem:[%s1300_s9 + $0x18] sm:$0xff]   ;;  %v1120_v12 = vld [vmem:[%s1300_s9 + $0x20] sm:$0xff]   ;;  %v1122_v14 = vld [vmem:[%s1300_s9 + $0x28] sm:$0xff]  }
  0x1d   : > { %1029 = vmatmul.mubr.msk.bf16.vlgmr.msra.gmra.mrb[0].mxu1 %vm463_vm1, %v1115_v7  ;;  %1016 = vmatprep.mubr.msk.bf16.mxu0 %vm463_vm1, %v1116_v8  ;;  %v1119_v11 = vld [vmem:[%s1300_s9 + $0x58] sm:$0xff]   ;;  %v1121_v13 = vld [vmem:[%s1300_s9 + $0x60] sm:$0xff]   ;;  %v1123_v15 = vld [vmem:[%s1300_s9 + $0x68] sm:$0xff]   ;;  %p1131_p0 = pneg %p1130_p13  ;;  %p1137_p3 = por %p1136_p2, %p1135_p1 }
  0x1e   : > { %1032 = vmatprep.mubr.msk.bf16.mxu1 %vm463_vm1, %v1117_v9  ;;  %v1124_v16 = vld [vmem:[%s1300_s9 + $0x30] sm:$0xff]   ;;  %v1126_v18 = vld [vmem:[%s1300_s9 + $0x38] sm:$0xff]  }
  0x1f   : > { %v1125_v17 = vld [vmem:[%s1300_s9 + $0x70] sm:$0xff]   ;;  %v1127_v19 = vld [vmem:[%s1300_s9 + $0x78] sm:$0xff]   ;;  %p1138_p5 = pnand %p1137_p3, %p1131_p0 }
  0x24   : > { %1017 = vmatmul.mubr.msk.bf16.gmra.mrb[4].mxu0 %vm463_vm1, %v1118_v10 }
  0x25   : > { %1033 = vmatmul.mubr.msk.bf16.gmra.mrb[4].mxu1 %vm463_vm1, %v1119_v11  ;;  %1020 = vmatprep.mubr.msk.bf16.mxu0 %vm463_vm1, %v1120_v12 }
  0x26   : > { %1036 = vmatprep.mubr.msk.bf16.mxu1 %vm463_vm1, %v1121_v13 }
  0x2c   : > { %1021 = vmatmul.mubr.msk.bf16.gmra.mrb[8].mxu0 %vm463_vm1, %v1122_v14 }
  0x2d   : > { %1037 = vmatmul.mubr.msk.bf16.gmra.mrb[8].mxu1 %vm463_vm1, %v1123_v15  ;;  %1024 = vmatprep.mubr.msk.bf16.mxu0 %vm463_vm1, %v1124_v16 }
  0x2e   : > { %1040 = vmatprep.mubr.msk.bf16.mxu1 %vm463_vm1, %v1125_v17 }
  0x34   : > { %1025 = vmatmul.mubr.msk.bf16.gmra.mrb[12].mxu0 %vm463_vm1, %v1126_v18 }
  0x35   : > { %1041 = vmatmul.mubr.msk.bf16.gmra.mrb[12].mxu1 %vm463_vm1, %v1127_v19 }
  0xef   : > { %v1014_v21 = vpop.f32.mrb[0].mxu0 }
  0xf0   : > { %v1030_v22 = vpop.f32.mrb[0].mxu1  ;;  %v550_v23 = vpop.f32.mrb[1].mxu0  ;;  %v559_v37 = vadd.f32 %v1014_v21, %v1337_v20 }
  0xf1   : > { %v614_v24 = vpop.f32.mrb[1].mxu1  ;;  %v1015_v25 = vpop.f32.mrb[2].mxu0  ;;  %v551_v28 = vadd.f32 %v1337_v20, %v550_v23  ;;  %v623_v38 = vadd.f32 %v1030_v22, %v1337_v20 }
  0xf2   : > { %v1031_v26 = vpop.f32.mrb[2].mxu1  ;;  %v615_v27 = vadd.f32 %v1337_v20, %v614_v24  ;;  %v553_v29 = vpop.f32.mrb[3].mxu0  ;;  %v562_v43 = vadd.f32 %v1015_v25, %v1337_v20 }
  0xf3   : > { %v617_v30 = vpop.f32.mrb[3].mxu1  ;;  %677 = vxpose.xlu0.b32.start [1/16] %v551_v28, 128  ;;  %v554_v31 = vadd.f32 %v1337_v20, %v553_v29  ;;  %v626_v44 = vadd.f32 %v1031_v26, %v1337_v20 }
  0xf4   : > { %709 = vxpose.xlu1.b32.start [1/16] %v615_v27, 128  ;;  %v618_v32 = vadd.f32 %v1337_v20, %v617_v30 }
  0xf7   : > { %678 = vxpose.xlu0.b32.cont [2/16] %v554_v31, 128  ;;  %v1018_v33 = vpop.f32.mrb[4].mxu0 }
  0xf8   : > { %710 = vxpose.xlu1.b32.cont [2/16] %v618_v32, 128  ;;  %v1034_v34 = vpop.f32.mrb[4].mxu1  ;;  %v566_v35 = vpop.f32.mrb[5].mxu0  ;;  %v575_v61 = vadd.f32 %v1018_v33, %v1337_v20 }
  0xf9   : > { %v630_v36 = vpop.f32.mrb[5].mxu1  ;;  %v1019_v39 = vpop.f32.mrb[6].mxu0  ;;  %v567_v45 = vadd.f32 %v1337_v20, %v566_v35  ;;  %v639_v62 = vadd.f32 %v1034_v34, %v1337_v20 }
  0xfa   : > { %v1035_v40 = vpop.f32.mrb[6].mxu1  ;;  %v569_v42 = vpop.f32.mrb[7].mxu0  ;;  %v631_v46 = vadd.f32 %v1337_v20, %v630_v36  ;;  %v578_v3 = vadd.f32 %v1019_v39, %v1337_v20 }
  0xfb   : > { %v633_v41 = vpop.f32.mrb[7].mxu1  ;;  %679 = vxpose.xlu0.b32.cont [3/16] %v559_v37, 128  ;;  %v570_v56 = vadd.f32 %v1337_v20, %v569_v42  ;;  %v642_v4 = vadd.f32 %v1035_v40, %v1337_v20 }
  0xfc   : > { %711 = vxpose.xlu1.b32.cont [3/16] %v623_v38, 128  ;;  %v634_v55 = vadd.f32 %v1337_v20, %v633_v41 }
  0xff   : > { %680 = vxpose.xlu0.b32.cont [4/16] %v562_v43, 128  ;;  %v1022_v47 = vpop.f32.mrb[8].mxu0 }
 0x100   : > { %712 = vxpose.xlu1.b32.cont [4/16] %v626_v44, 128  ;;  %v1038_v48 = vpop.f32.mrb[8].mxu1  ;;  %v582_v49 = vpop.f32.mrb[9].mxu0  ;;  %v591_v9 = vadd.f32 %v1022_v47, %v1337_v20 }
 0x101   : > { %v646_v50 = vpop.f32.mrb[9].mxu1  ;;  %v1023_v51 = vpop.f32.mrb[10].mxu0  ;;  %v583_v5 = vadd.f32 %v1337_v20, %v582_v49  ;;  %v655_v10 = vadd.f32 %v1038_v48, %v1337_v20 }
 0x102   : > { %v1039_v52 = vpop.f32.mrb[10].mxu1  ;;  %v585_v54 = vpop.f32.mrb[11].mxu0  ;;  %v647_v6 = vadd.f32 %v1337_v20, %v646_v50  ;;  %v594_v11 = vadd.f32 %v1023_v51, %v1337_v20 }
 0x103   : > { %v649_v53 = vpop.f32.mrb[11].mxu1  ;;  %681 = vxpose.xlu0.b32.cont [5/16] %v567_v45, 128  ;;  %v586_v8 = vadd.f32 %v1337_v20, %v585_v54  ;;  %v658_v12 = vadd.f32 %v1039_v52, %v1337_v20 }
 0x104   : > { %713 = vxpose.xlu1.b32.cont [5/16] %v631_v46, 128  ;;  %v650_v7 = vadd.f32 %v1337_v20, %v649_v53 }
 0x107   : > { %682 = vxpose.xlu0.b32.cont [6/16] %v570_v56, 128  ;;  %v1026_v57 = vpop.f32.mrb[12].mxu0 }
 0x108   : > { %714 = vxpose.xlu1.b32.cont [6/16] %v634_v55, 128  ;;  %v1042_v58 = vpop.f32.mrb[12].mxu1  ;;  %v598_v59 = vpop.f32.mrb[13].mxu0  ;;  %v607_v17 = vadd.f32 %v1026_v57, %v1337_v20 }
 0x109   : > { %v662_v60 = vpop.f32.mrb[13].mxu1  ;;  %v1027_v63 = vpop.f32.mrb[14].mxu0  ;;  %v599_v13 = vadd.f32 %v1337_v20, %v598_v59  ;;  %v671_v18 = vadd.f32 %v1042_v58, %v1337_v20 }
 0x10a   : > { %v1043_v0 = vpop.f32.mrb[14].mxu1  ;;  %v601_v2 = vpop.f32.mrb[15].mxu0  ;;  %v663_v14 = vadd.f32 %v1337_v20, %v662_v60  ;;  %v610_v19 = vadd.f32 %v1027_v63, %v1337_v20 }
 0x10b   : > { %v665_v1 = vpop.f32.mrb[15].mxu1  ;;  %683 = vxpose.xlu0.b32.cont [7/16] %v575_v61, 128  ;;  %v602_v16 = vadd.f32 %v1337_v20, %v601_v2  ;;  %v674_v21 = vadd.f32 %v1043_v0, %v1337_v20 }
 0x10c   : > { %715 = vxpose.xlu1.b32.cont [7/16] %v639_v62, 128  ;;  %v666_v15 = vadd.f32 %v1337_v20, %v665_v1 }
 0x10f   : > { %684 = vxpose.xlu0.b32.cont [8/16] %v578_v3, 128 }
 0x110   : > { %716 = vxpose.xlu1.b32.cont [8/16] %v642_v4, 128 }
 0x113   : > { %685 = vxpose.xlu0.b32.cont [9/16] %v583_v5, 128 }
 0x114   : > { %717 = vxpose.xlu1.b32.cont [9/16] %v647_v6, 128 }
 0x117   : > { %686 = vxpose.xlu0.b32.cont [10/16] %v586_v8, 128 }
 0x118   : > { %718 = vxpose.xlu1.b32.cont [10/16] %v650_v7, 128 }
 0x11b   : > { %687 = vxpose.xlu0.b32.cont [11/16] %v591_v9, 128 }
 0x11c   : > { %719 = vxpose.xlu1.b32.cont [11/16] %v655_v10, 128 }
 0x11f   : > { %688 = vxpose.xlu0.b32.cont [12/16] %v594_v11, 128 }
 0x120   : > { %720 = vxpose.xlu1.b32.cont [12/16] %v658_v12, 128 }
 0x123   : > { %689 = vxpose.xlu0.b32.cont [13/16] %v599_v13, 128 }
 0x124   : > { %721 = vxpose.xlu1.b32.cont [13/16] %v663_v14, 128 }
 0x127   : > { %690 = vxpose.xlu0.b32.cont [14/16] %v602_v16, 128 }
 0x128   : > { %722 = vxpose.xlu1.b32.cont [14/16] %v666_v15, 128 }
 0x12b   : > { %691 = vxpose.xlu0.b32.cont [15/16] %v607_v17, 128 }
 0x12c   : > { %723 = vxpose.xlu1.b32.cont [15/16] %v671_v18, 128 }
 0x12f   : > { %692 = vxpose.xlu0.b32.end [16/16] %v610_v19, 128 }
 0x130   : > { %724 = vxpose.xlu1.b32.end [16/16] %v674_v21, 128 }
 0x173   : > { %v693_v23 = vpop.trf.xlu0 }
 0x174   : > { %v725_v22 = vpop.trf.xlu1  ;;  %741 = vst [vmem:[%s1374_s21] sm:$0xff] %v693_v23 }
 0x175   : > { %742 = vst [vmem:[%s1374_s21 + $0x8] sm:$0xff] %v725_v22 }
 0x177   : > { %v694_v24 = vpop.trf.xlu0 }
 0x178   : > { %v726_v20 = vpop.trf.xlu1  ;;  %743 = vst [vmem:[%s1374_s21 + $0x10] sm:$0xff] %v694_v24 }
 0x179   : > { %744 = vst [vmem:[%s1374_s21 + $0x18] sm:$0xff] %v726_v20 }
 0x17b   : > { %v695_v26 = vpop.trf.xlu0 }
 0x17c   : > { %v727_v25 = vpop.trf.xlu1  ;;  %745 = vst [vmem:[%s1374_s21 + $0x20] sm:$0xff] %v695_v26 }
 0x17d   : > { %746 = vst [vmem:[%s1374_s21 + $0x28] sm:$0xff] %v727_v25 }
 0x17f   : > { %v696_v28 = vpop.trf.xlu0 }
 0x180   : > { %v728_v27 = vpop.trf.xlu1  ;;  %747 = vst [vmem:[%s1374_s21 + $0x30] sm:$0xff] %v696_v28 }
 0x181   : > { %748 = vst [vmem:[%s1374_s21 + $0x38] sm:$0xff] %v728_v27 }
 0x183   : > { %v697_v30 = vpop.trf.xlu0 }
 0x184   : > { %v729_v29 = vpop.trf.xlu1  ;;  %749 = vst [vmem:[%s1374_s21 + $0x40] sm:$0xff] %v697_v30 }
 0x185   : > { %750 = vst [vmem:[%s1374_s21 + $0x48] sm:$0xff] %v729_v29 }
 0x187   : > { %v698_v32 = vpop.trf.xlu0 }
 0x188   : > { %v730_v31 = vpop.trf.xlu1  ;;  %751 = vst [vmem:[%s1374_s21 + $0x50] sm:$0xff] %v698_v32 }
 0x189   : > { %752 = vst [vmem:[%s1374_s21 + $0x58] sm:$0xff] %v730_v31 }
 0x18b   : > { %v699_v34 = vpop.trf.xlu0 }
 0x18c   : > { %v731_v33 = vpop.trf.xlu1  ;;  %753 = vst [vmem:[%s1374_s21 + $0x60] sm:$0xff] %v699_v34 }
 0x18d   : > { %754 = vst [vmem:[%s1374_s21 + $0x68] sm:$0xff] %v731_v33 }
 0x18f   : > { %v700_v36 = vpop.trf.xlu0 }
 0x190   : > { %v732_v35 = vpop.trf.xlu1  ;;  %755 = vst [vmem:[%s1374_s21 + $0x70] sm:$0xff] %v700_v36 }
 0x191   : > { %756 = vst [vmem:[%s1374_s21 + $0x78] sm:$0xff] %v732_v35 }
 0x193   : > { %v701_v38 = vpop.trf.xlu0 }
 0x194   : > { %v733_v37 = vpop.trf.xlu1  ;;  %757 = vst [vmem:[%s1374_s21 + $0x80] sm:$0xff] %v701_v38 }
 0x195   : > { %758 = vst [vmem:[%s1374_s21 + $0x88] sm:$0xff] %v733_v37 }
 0x197   : > { %v702_v40 = vpop.trf.xlu0 }
 0x198   : > { %v734_v39 = vpop.trf.xlu1  ;;  %759 = vst [vmem:[%s1374_s21 + $0x90] sm:$0xff] %v702_v40 }
 0x199   : > { %760 = vst [vmem:[%s1374_s21 + $0x98] sm:$0xff] %v734_v39 }
 0x19b   : > { %v703_v42 = vpop.trf.xlu0 }
 0x19c   : > { %v735_v41 = vpop.trf.xlu1  ;;  %761 = vst [vmem:[%s1374_s21 + $0xa0] sm:$0xff] %v703_v42 }
 0x19d   : > { %762 = vst [vmem:[%s1374_s21 + $0xa8] sm:$0xff] %v735_v41 }
 0x19f   : > { %v704_v44 = vpop.trf.xlu0 }
 0x1a0   : > { %v736_v43 = vpop.trf.xlu1  ;;  %763 = vst [vmem:[%s1374_s21 + $0xb0] sm:$0xff] %v704_v44 }
 0x1a1   : > { %764 = vst [vmem:[%s1374_s21 + $0xb8] sm:$0xff] %v736_v43 }
 0x1a3   : > { %v705_v46 = vpop.trf.xlu0 }
 0x1a4   : > { %v737_v45 = vpop.trf.xlu1  ;;  %765 = vst [vmem:[%s1374_s21 + $0xc0] sm:$0xff] %v705_v46 }
 0x1a5   : > { %766 = vst [vmem:[%s1374_s21 + $0xc8] sm:$0xff] %v737_v45 }
 0x1a7   : > { %v706_v48 = vpop.trf.xlu0 }
 0x1a8   : > { %v738_v47 = vpop.trf.xlu1  ;;  %767 = vst [vmem:[%s1374_s21 + $0xd0] sm:$0xff] %v706_v48 }
 0x1a9   : > { %768 = vst [vmem:[%s1374_s21 + $0xd8] sm:$0xff] %v738_v47 }
 0x1ab   : > { %v707_v50 = vpop.trf.xlu0 }
 0x1ac   : > { %v739_v49 = vpop.trf.xlu1  ;;  %769 = vst [vmem:[%s1374_s21 + $0xe0] sm:$0xff] %v707_v50 }
 0x1ad   : > { %770 = vst [vmem:[%s1374_s21 + $0xe8] sm:$0xff] %v739_v49 }
 0x1af   : > { %v708_v52 = vpop.trf.xlu0 }
 0x1b0   : > { %v740_v51 = vpop.trf.xlu1  ;;  %771 = vst [vmem:[%s1374_s21 + $0xf0] sm:$0xff] %v708_v52 }
 0x1b1   : > { %772 = vst [vmem:[%s1374_s21 + $0xf8] sm:$0xff] %v740_v51 }
 0x1b2   : > { %1141 = shalt.err (!%p1138_p5)
}
 0x1b3   : > { %s1142_s7 = scalar_lea.hbm %s1411_s29, 4096  ;;  %s1146_s10 = scalar_lea.hbm %s1468_s3, 8192 }
 0x1b4   : > { %p1143_p6 = scmp.ne.s32.totalorder %s1411_s29, %s1142_s7  ;;  %p1147_p10 = scmp.lt.u32.totalorder %s1411_s29, %s1468_s3 }
 0x1b5   : > { %p1148_p11 = scmp.lt.u32.totalorder %s1146_s10, %s1142_s7  ;;  %p1150_p13 = scmp.lt.u32.totalorder %s1142_s7, %s1411_s29 }
 0x1b6   : > { %p1144_p7 = pnand %p1143_p6, %p1271_p4 }
 0x1b7   : > { %p1149_p12 = por %p1148_p11, %p1147_p10 }
 0x1b8   : > { %p1145_p9 = pneg %p1144_p7 }
 0x1b9   : > { %p1151_p0 = por %p1150_p13, %p1149_p12 }
 0x1bb   : > { %p1152_p1 = pnand %p1151_p0, %p1145_p9 }
 0x1bd   : > { %1155 = shalt.err (!%p1152_p1)
}
 0x1be   : > { %s1209_s19 = smov 256   ;;  %s1210_s21 = smov 16  }
 0x1bf   : > { %1052 = dma.vmem_to_hbm [thread:$0]  (%p1271_p4), %s1413_s26, 4096, %s1411_s29, %s1419_s15, %s1209_s19, %s1209_s19, %s1210_s21  }
 0x1c0 PF: > { %p1058_p2 = scmp.ge.s32.totalorder %s1206_s17, 2  ;;  %s809_s23 = sand.u32 1, %s1186_s12  }
 0x1c1   : > { %s810_s27 = scalar_lea.sflag [#allocation3], %s809_s23 }
 0x1c2   : > { %p1055_p3 = pnand %p1058_p2, %p1278_p8 }
 0x1c4   : > { %1181 = dma.done.wait (!%p1055_p3), %s810_s27, 4096  }
 0x1c5   : > { %1183 = vsyncadd (!%p1055_p3), %s810_s27, 4294963200  ;;  %s16_s17 = sadd.s32 1, %s1206_s17   ;;  %s1471_s12 = smov %s1190_s13 }
 0x1c6   : > { %p13_p5 = scmp.ge.s32.totalorder %s16_s17, 4   ;;  %s1472_s13 = smov %s1194_s14 }
 0x1c7   : > { %s1473_s14 = smov %s1284_s25  ;;  %s1474_s15 = smov %s1202_s16 }
 0x1c8   : > { %s1475_s16 = smov %s1477_s20  ;;  %15 = sbr.rel (!%p13_p5) target bundleno = 4 (0x4), region = 73 }
 0x1cf   :  { %815 = vsyncpa [#allocation3], 1 }
 0x1d0   :  { %817 = vsyncpa [#allocation3 + $0x1], 1 }

</bundles_post_ra>
